<compile_context>
chip_gen: v7x
topology: tpu7x:2x2x1
jax: 0.10.0
libtpu: 0.0.40
codegen_flags: <defaults>
</compile_context>

<pallas_src>
import math

import jax
import jax.numpy as jnp
from jax import lax
from jax.experimental import pallas as pl
from jax.experimental.pallas import tpu as pltpu

LATENT = 32
NUM_NODES = 8
FEATURE_DIM = 16                      # output last dim = 8 * 16 = 128 (lane-dense)
OUT_DIM = NUM_NODES * FEATURE_DIM
LN_EPS = 1e-5
LEAKY_SLOPE = 0.02


def _leaky_relu(x):
    return jnp.maximum(x, LEAKY_SLOPE * x)


def _round_up(x, m):
    return ((x + m - 1) // m) * m


def generator_kernel(z_ref,
                     w1_ref, p1_ref, jh1_ref,
                     w2_ref, p2_ref, jh2_ref,
                     w3_ref, p3_ref, jh3_ref,
                     out_ref):
    """One batch tile: (TB, L) -> (TB, OUT_DIM). Weights/constants stay VMEM-resident."""

    def layer(x, w_ref, p_ref, jh_ref, act):
        p = p_ref[...]                                   # (3, H) f32: [bias; gamma; beta]
        b, g, be = p[0:1, :], p[1:2, :], p[2:3, :]
        # Linear: bf16 MXU inputs, f32 accumulation.
        h = jnp.dot(x.astype(jnp.bfloat16), w_ref[...],
                    preferred_element_type=jnp.float32) + b
        # LayerNorm with row statistics on the MXU instead of XLU lane-reductions:
        #   h @ (J/H)        -> row mean, already broadcast to (TB, H)
        #   (hc*hc) @ (J/H)  -> exact two-pass row variance, broadcast to (TB, H)
        jh = jh_ref[...]                                 # (H, H) f32, every entry 1/H
        mu_b = jnp.dot(h, jh, preferred_element_type=jnp.float32)
        hc = h - mu_b
        var_b = jnp.dot(hc * hc, jh, preferred_element_type=jnp.float32)
        y = hc * (lax.rsqrt(var_b + LN_EPS) * g) + be
        # TODO(synk): Dropout(0.4) is eval-mode identity; training-mode would need
        #             pltpu.prng_seed/prng_random_bits masking + 1/(1-p) scaling.
        return act(y)

    h = layer(z_ref[...], w1_ref, p1_ref, jh1_ref, _leaky_relu)   # (TB, 2L)
    h = layer(h,          w2_ref, p2_ref, jh2_ref, _leaky_relu)   # (TB, 4L)
    h = layer(h,          w3_ref, p3_ref, jh3_ref, jnp.tanh)      # (TB, OUT_DIM)
    out_ref[...] = h.astype(out_ref.dtype)


def make_generator_params(key, latent=LATENT, num_nodes=NUM_NODES, feature_dim=FEATURE_DIM):
    dims = [(latent, 2 * latent),
            (2 * latent, 4 * latent),
            (4 * latent, num_nodes * feature_dim)]
    keys = jax.random.split(key, 2 * len(dims))
    params = {}
    for i, (fin, fout) in enumerate(dims):
        bound = 1.0 / math.sqrt(fin)                 # PyTorch nn.Linear default init range
        w = jax.random.uniform(keys[2 * i], (fin, fout), jnp.float32, -bound, bound)
        b = jax.random.uniform(keys[2 * i + 1], (fout,), jnp.float32, -bound, bound)
        g = jnp.ones((fout,), jnp.float32)           # LayerNorm weight
        be = jnp.zeros((fout,), jnp.float32)         # LayerNorm bias
        params[f"w{i + 1}"] = w.astype(jnp.bfloat16)                 # bf16 matmul weights
        params[f"p{i + 1}"] = jnp.stack([b, g, be], axis=0)          # (3, fout) f32
        # constant (H, H) all-1/H matrix for MXU-based LN row statistics / broadcast
        params[f"jh{i + 1}"] = jnp.full((fout, fout), 1.0 / fout, jnp.float32)
    return params


def _choose_tile(B, block_rows):
    """Batch-tile size: >=2 (target 4) tiles for non-trivial B (uses both v7x TCs and
    gives each core >=2 steps so the z/out double-buffering overlaps); tiles are
    multiples of 8 sublanes, capped at block_rows."""
    if B <= 128:
        return B                                      # single full-batch block
    target_tiles = max(4, pl.cdiv(B, block_rows))
    tb = max(128, _round_up(pl.cdiv(B, target_tiles), 8))
    return min(block_rows, tb)


def generator_forward(z, params, *, block_rows=2048, out_dtype=jnp.float32):
    """z: (B, latent) f32 -> (B, num_nodes, feature_dim) in out_dtype."""
    B, L = z.shape
    H3 = OUT_DIM

    TB = _choose_tile(B, block_rows)
    # Partial boundary block (when TB does not divide B) is masked by Pallas; no
    # wrapper-side pad/slice HBM passes.
    grid = (pl.cdiv(B, TB),)

    def resident(a):
        # weights / LN params / constants: same block every grid step -> stay in VMEM
        return pl.BlockSpec(a.shape, lambda i: (0, 0))

    in_specs = [pl.BlockSpec((TB, L), lambda i: (i, 0))]   # z tile (pipelined)
    operands = [z]
    for li in (1, 2, 3):
        for name in (f"w{li}", f"p{li}", f"jh{li}"):
            in_specs.append(resident(params[name]))
            operands.append(params[name])

    out_flat = pl.pallas_call(
        generator_kernel,
        out_shape=jax.ShapeDtypeStruct((B, H3), out_dtype),
        grid=grid,
        in_specs=in_specs,
        out_specs=pl.BlockSpec((TB, H3), lambda i: (i, 0)),   # lane-dense 128-wide stores
        compiler_params=pltpu.CompilerParams(dimension_semantics=("parallel",)),
    )(*operands)

    return out_flat.reshape(B, NUM_NODES, FEATURE_DIM)


def generator_reference(z, params):
    """Pure-JAX reference: bf16 weight matmuls, f32 two-pass LayerNorm."""
    h = z
    acts = (_leaky_relu, _leaky_relu, jnp.tanh)
    for i, act in enumerate(acts, start=1):
        w = params[f"w{i}"]
        b, g, be = params[f"p{i}"]
        h = jnp.dot(h.astype(jnp.bfloat16), w, preferred_element_type=jnp.float32) + b
        mu = jnp.mean(h, axis=-1, keepdims=True)
        var = jnp.mean((h - mu) ** 2, axis=-1, keepdims=True)
        h = (h - mu) * lax.rsqrt(var + LN_EPS) * g + be
        h = act(h)
    return h.reshape(-1, NUM_NODES, FEATURE_DIM)


if __name__ == "__main__":
    key = jax.random.PRNGKey(0)
    k_param, k_z1, k_z2 = jax.random.split(key, 3)
    params = make_generator_params(k_param)

    # Small batch: single-tile path, f32 output.
    B = 8
    z = jax.random.normal(k_z1, (B, LATENT), jnp.float32)
    out = jax.block_until_ready(generator_forward(z, params))
    assert out.shape == (B, NUM_NODES, FEATURE_DIM), out.shape
    assert out.dtype == jnp.float32
    assert bool(jnp.all(jnp.isfinite(out)))
    assert bool(jnp.all(jnp.abs(out) <= 1.0 + 1e-6))          # tanh output range
    ref = generator_reference(z, params)
    err = float(jnp.max(jnp.abs(out - ref)))
    assert err < 2e-2, err

    # Larger non-divisible batch: multi-tile pipelined grid with a partial boundary
    # block (no wrapper pad/slice) and the bf16 output path.
    B2 = 1030
    z2 = jax.random.normal(k_z2, (B2, LATENT), jnp.float32)
    out2 = jax.block_until_ready(
        generator_forward(z2, params, out_dtype=jnp.bfloat16))
    assert out2.shape == (B2, NUM_NODES, FEATURE_DIM), out2.shape
    assert out2.dtype == jnp.bfloat16
    out2_f = out2.astype(jnp.float32)
    assert bool(jnp.all(jnp.isfinite(out2_f)))
    assert bool(jnp.all(jnp.abs(out2_f) <= 1.0 + 1e-6))
    ref2 = generator_reference(z2, params)
    err2 = float(jnp.max(jnp.abs(out2_f - ref2)))
    assert err2 < 2.5e-2, err2                                # bf16 out adds ~4e-3 abs

    print("KERNEL_OK")
</pallas_src>

<mosaic_0001>
module attributes {stable_mosaic.version = 11 : i64} {
  func.func @generator_kernel(%arg0: i32, %arg1: memref<8x32xf32, #tpu.memory_space<vmem>>, %arg2: memref<32x64xbf16, #tpu.memory_space<vmem>>, %arg3: memref<3x64xf32, #tpu.memory_space<vmem>>, %arg4: memref<64x64xf32, #tpu.memory_space<vmem>>, %arg5: memref<64x128xbf16, #tpu.memory_space<vmem>>, %arg6: memref<3x128xf32, #tpu.memory_space<vmem>>, %arg7: memref<128x128xf32, #tpu.memory_space<vmem>>, %arg8: memref<128x128xbf16, #tpu.memory_space<vmem>>, %arg9: memref<3x128xf32, #tpu.memory_space<vmem>>, %arg10: memref<128x128xf32, #tpu.memory_space<vmem>>, %arg11: memref<8x128xf32, #tpu.memory_space<vmem>>) attributes {dimension_semantics = [#tpu.dimension_semantics<parallel>], iteration_bounds = array<i64: 1>, scalar_prefetch = 0 : i64, scratch_operands = 0 : i64, tpu.core_type = #tpu.core_type<tc>, window_params = [{transform_indices = @transform_0, window_bounds = array<i64: 8, 32>}, {pipeline_mode = #tpu.pipeline_mode<synchronous>, transform_indices = @transform_1, window_bounds = array<i64: 32, 64>}, {pipeline_mode = #tpu.pipeline_mode<synchronous>, transform_indices = @transform_2, window_bounds = array<i64: 3, 64>}, {pipeline_mode = #tpu.pipeline_mode<synchronous>, transform_indices = @transform_3, window_bounds = array<i64: 64, 64>}, {pipeline_mode = #tpu.pipeline_mode<synchronous>, transform_indices = @transform_4, window_bounds = array<i64: 64, 128>}, {pipeline_mode = #tpu.pipeline_mode<synchronous>, transform_indices = @transform_5, window_bounds = array<i64: 3, 128>}, {pipeline_mode = #tpu.pipeline_mode<synchronous>, transform_indices = @transform_6, window_bounds = array<i64: 128, 128>}, {pipeline_mode = #tpu.pipeline_mode<synchronous>, transform_indices = @transform_7, window_bounds = array<i64: 128, 128>}, {pipeline_mode = #tpu.pipeline_mode<synchronous>, transform_indices = @transform_8, window_bounds = array<i64: 3, 128>}, {pipeline_mode = #tpu.pipeline_mode<synchronous>, transform_indices = @transform_9, window_bounds = array<i64: 128, 128>}, {transform_indices = @transform_10, window_bounds = array<i64: 8, 128>}]} {
    %c0 = arith.constant 0 : index
    %c0_0 = arith.constant 0 : index
    %0 = vector.load %arg1[%c0, %c0_0] : memref<8x32xf32, #tpu.memory_space<vmem>>, vector<8x32xf32>
    %c0_1 = arith.constant 0 : index
    %c0_2 = arith.constant 0 : index
    %1 = vector.load %arg3[%c0_1, %c0_2] : memref<3x64xf32, #tpu.memory_space<vmem>>, vector<3x64xf32>
    %2 = vector.extract_strided_slice %1 {offsets = [0, 0], sizes = [1, 64], strides = [1, 1]} : vector<3x64xf32> to vector<1x64xf32>
    %3 = vector.extract_strided_slice %1 {offsets = [1, 0], sizes = [1, 64], strides = [1, 1]} : vector<3x64xf32> to vector<1x64xf32>
    %4 = vector.extract_strided_slice %1 {offsets = [2, 0], sizes = [1, 64], strides = [1, 1]} : vector<3x64xf32> to vector<1x64xf32>
    %5 = arith.truncf %0 : vector<8x32xf32> to vector<8x32xbf16>
    %c0_3 = arith.constant 0 : index
    %c0_4 = arith.constant 0 : index
    %6 = vector.load %arg2[%c0_3, %c0_4] : memref<32x64xbf16, #tpu.memory_space<vmem>>, vector<32x64xbf16>
    %cst = arith.constant dense<0.000000e+00> : vector<8x64xf32>
    %7 = tpu.matmul %5, %6, %cst {dimension_numbers = #tpu.dot_dimension_numbers<[1], [0], [0], [1], [0, 0, 1, 1], [], []>} : vector<8x32xbf16>, vector<32x64xbf16>, vector<8x64xf32> -> vector<8x64xf32>
    %8 = vector.broadcast %2 : vector<1x64xf32> to vector<8x64xf32>
    %9 = arith.addf %7, %8 : vector<8x64xf32>
    %c0_5 = arith.constant 0 : index
    %c0_6 = arith.constant 0 : index
    %10 = vector.load %arg4[%c0_5, %c0_6] : memref<64x64xf32, #tpu.memory_space<vmem>>, vector<64x64xf32>
    %cst_7 = arith.constant dense<0.000000e+00> : vector<8x64xf32>
    %11 = tpu.matmul %9, %10, %cst_7 {dimension_numbers = #tpu.dot_dimension_numbers<[1], [0], [0], [1], [0, 0, 1, 1], [], []>} : vector<8x64xf32>, vector<64x64xf32>, vector<8x64xf32> -> vector<8x64xf32>
    %12 = arith.subf %9, %11 : vector<8x64xf32>
    %13 = arith.mulf %12, %12 : vector<8x64xf32>
    %cst_8 = arith.constant dense<0.000000e+00> : vector<8x64xf32>
    %14 = tpu.matmul %13, %10, %cst_8 {dimension_numbers = #tpu.dot_dimension_numbers<[1], [0], [0], [1], [0, 0, 1, 1], [], []>} : vector<8x64xf32>, vector<64x64xf32>, vector<8x64xf32> -> vector<8x64xf32>
    %cst_9 = arith.constant 9.99999974E-6 : f32
    %15 = vector.broadcast %cst_9 : f32 to vector<8x64xf32>
    %16 = arith.addf %14, %15 : vector<8x64xf32>
    %17 = math.rsqrt %16 : vector<8x64xf32>
    %18 = vector.broadcast %3 : vector<1x64xf32> to vector<8x64xf32>
    %19 = arith.mulf %17, %18 : vector<8x64xf32>
    %20 = arith.mulf %12, %19 : vector<8x64xf32>
    %21 = vector.broadcast %4 : vector<1x64xf32> to vector<8x64xf32>
    %22 = arith.addf %20, %21 : vector<8x64xf32>
    %cst_10 = arith.constant 2.000000e-02 : f32
    %23 = vector.broadcast %cst_10 : f32 to vector<8x64xf32>
    %24 = arith.mulf %23, %22 : vector<8x64xf32>
    %25 = arith.maximumf %22, %24 : vector<8x64xf32>
    %c0_11 = arith.constant 0 : index
    %c0_12 = arith.constant 0 : index
    %26 = vector.load %arg6[%c0_11, %c0_12] : memref<3x128xf32, #tpu.memory_space<vmem>>, vector<3x128xf32>
    %27 = vector.extract_strided_slice %26 {offsets = [0, 0], sizes = [1, 128], strides = [1, 1]} : vector<3x128xf32> to vector<1x128xf32>
    %28 = vector.extract_strided_slice %26 {offsets = [1, 0], sizes = [1, 128], strides = [1, 1]} : vector<3x128xf32> to vector<1x128xf32>
    %29 = vector.extract_strided_slice %26 {offsets = [2, 0], sizes = [1, 128], strides = [1, 1]} : vector<3x128xf32> to vector<1x128xf32>
    %30 = arith.truncf %25 : vector<8x64xf32> to vector<8x64xbf16>
    %c0_13 = arith.constant 0 : index
    %c0_14 = arith.constant 0 : index
    %31 = vector.load %arg5[%c0_13, %c0_14] : memref<64x128xbf16, #tpu.memory_space<vmem>>, vector<64x128xbf16>
    %cst_15 = arith.constant dense<0.000000e+00> : vector<8x128xf32>
    %32 = tpu.matmul %30, %31, %cst_15 {dimension_numbers = #tpu.dot_dimension_numbers<[1], [0], [0], [1], [0, 0, 1, 1], [], []>} : vector<8x64xbf16>, vector<64x128xbf16>, vector<8x128xf32> -> vector<8x128xf32>
    %33 = vector.broadcast %27 : vector<1x128xf32> to vector<8x128xf32>
    %34 = arith.addf %32, %33 : vector<8x128xf32>
    %c0_16 = arith.constant 0 : index
    %c0_17 = arith.constant 0 : index
    %35 = vector.load %arg7[%c0_16, %c0_17] : memref<128x128xf32, #tpu.memory_space<vmem>>, vector<128x128xf32>
    %cst_18 = arith.constant dense<0.000000e+00> : vector<8x128xf32>
    %36 = tpu.matmul %34, %35, %cst_18 {dimension_numbers = #tpu.dot_dimension_numbers<[1], [0], [0], [1], [0, 0, 1, 1], [], []>} : vector<8x128xf32>, vector<128x128xf32>, vector<8x128xf32> -> vector<8x128xf32>
    %37 = arith.subf %34, %36 : vector<8x128xf32>
    %38 = arith.mulf %37, %37 : vector<8x128xf32>
    %cst_19 = arith.constant dense<0.000000e+00> : vector<8x128xf32>
    %39 = tpu.matmul %38, %35, %cst_19 {dimension_numbers = #tpu.dot_dimension_numbers<[1], [0], [0], [1], [0, 0, 1, 1], [], []>} : vector<8x128xf32>, vector<128x128xf32>, vector<8x128xf32> -> vector<8x128xf32>
    %cst_20 = arith.constant 9.99999974E-6 : f32
    %40 = vector.broadcast %cst_20 : f32 to vector<8x128xf32>
    %41 = arith.addf %39, %40 : vector<8x128xf32>
    %42 = math.rsqrt %41 : vector<8x128xf32>
    %43 = vector.broadcast %28 : vector<1x128xf32> to vector<8x128xf32>
    %44 = arith.mulf %42, %43 : vector<8x128xf32>
    %45 = arith.mulf %37, %44 : vector<8x128xf32>
    %46 = vector.broadcast %29 : vector<1x128xf32> to vector<8x128xf32>
    %47 = arith.addf %45, %46 : vector<8x128xf32>
    %cst_21 = arith.constant 2.000000e-02 : f32
    %48 = vector.broadcast %cst_21 : f32 to vector<8x128xf32>
    %49 = arith.mulf %48, %47 : vector<8x128xf32>
    %50 = arith.maximumf %47, %49 : vector<8x128xf32>
    %c0_22 = arith.constant 0 : index
    %c0_23 = arith.constant 0 : index
    %51 = vector.load %arg9[%c0_22, %c0_23] : memref<3x128xf32, #tpu.memory_space<vmem>>, vector<3x128xf32>
    %52 = vector.extract_strided_slice %51 {offsets = [0, 0], sizes = [1, 128], strides = [1, 1]} : vector<3x128xf32> to vector<1x128xf32>
    %53 = vector.extract_strided_slice %51 {offsets = [1, 0], sizes = [1, 128], strides = [1, 1]} : vector<3x128xf32> to vector<1x128xf32>
    %54 = vector.extract_strided_slice %51 {offsets = [2, 0], sizes = [1, 128], strides = [1, 1]} : vector<3x128xf32> to vector<1x128xf32>
    %55 = arith.truncf %50 : vector<8x128xf32> to vector<8x128xbf16>
    %c0_24 = arith.constant 0 : index
    %c0_25 = arith.constant 0 : index
    %56 = vector.load %arg8[%c0_24, %c0_25] : memref<128x128xbf16, #tpu.memory_space<vmem>>, vector<128x128xbf16>
    %cst_26 = arith.constant dense<0.000000e+00> : vector<8x128xf32>
    %57 = tpu.matmul %55, %56, %cst_26 {dimension_numbers = #tpu.dot_dimension_numbers<[1], [0], [0], [1], [0, 0, 1, 1], [], []>} : vector<8x128xbf16>, vector<128x128xbf16>, vector<8x128xf32> -> vector<8x128xf32>
    %58 = vector.broadcast %52 : vector<1x128xf32> to vector<8x128xf32>
    %59 = arith.addf %57, %58 : vector<8x128xf32>
    %c0_27 = arith.constant 0 : index
    %c0_28 = arith.constant 0 : index
    %60 = vector.load %arg10[%c0_27, %c0_28] : memref<128x128xf32, #tpu.memory_space<vmem>>, vector<128x128xf32>
    %cst_29 = arith.constant dense<0.000000e+00> : vector<8x128xf32>
    %61 = tpu.matmul %59, %60, %cst_29 {dimension_numbers = #tpu.dot_dimension_numbers<[1], [0], [0], [1], [0, 0, 1, 1], [], []>} : vector<8x128xf32>, vector<128x128xf32>, vector<8x128xf32> -> vector<8x128xf32>
    %62 = arith.subf %59, %61 : vector<8x128xf32>
    %63 = arith.mulf %62, %62 : vector<8x128xf32>
    %cst_30 = arith.constant dense<0.000000e+00> : vector<8x128xf32>
    %64 = tpu.matmul %63, %60, %cst_30 {dimension_numbers = #tpu.dot_dimension_numbers<[1], [0], [0], [1], [0, 0, 1, 1], [], []>} : vector<8x128xf32>, vector<128x128xf32>, vector<8x128xf32> -> vector<8x128xf32>
    %cst_31 = arith.constant 9.99999974E-6 : f32
    %65 = vector.broadcast %cst_31 : f32 to vector<8x128xf32>
    %66 = arith.addf %64, %65 : vector<8x128xf32>
    %67 = math.rsqrt %66 : vector<8x128xf32>
    %68 = vector.broadcast %53 : vector<1x128xf32> to vector<8x128xf32>
    %69 = arith.mulf %67, %68 : vector<8x128xf32>
    %70 = arith.mulf %62, %69 : vector<8x128xf32>
    %71 = vector.broadcast %54 : vector<1x128xf32> to vector<8x128xf32>
    %72 = arith.addf %70, %71 : vector<8x128xf32>
    %73 = math.tanh %72 : vector<8x128xf32>
    %c0_32 = arith.constant 0 : index
    %c0_33 = arith.constant 0 : index
    %74 = vector.load %arg11[%c0_32, %c0_33] : memref<8x128xf32, #tpu.memory_space<vmem>>, vector<8x128xf32>
    tpu.vector_store %arg11[%c0_32, %c0_33], %73 {strides = array<i32>} : memref<8x128xf32, #tpu.memory_space<vmem>>, vector<8x128xf32>,
    return
  }
  func.func @transform_0(%arg0: i32) -> (i32, i32) {
    %c0_i32 = arith.constant 0 : i32
    %c0_i32_0 = arith.constant 0 : i32
    return %arg0, %c0_i32 : i32, i32
  }
  func.func @transform_1(%arg0: i32) -> (i32, i32) {
    %c0_i32 = arith.constant 0 : i32
    %c0_i32_0 = arith.constant 0 : i32
    %c0_i32_1 = arith.constant 0 : i32
    return %c0_i32, %c0_i32_0 : i32, i32
  }
  func.func @transform_2(%arg0: i32) -> (i32, i32) {
    %c0_i32 = arith.constant 0 : i32
    %c0_i32_0 = arith.constant 0 : i32
    %c0_i32_1 = arith.constant 0 : i32
    return %c0_i32, %c0_i32_0 : i32, i32
  }
  func.func @transform_3(%arg0: i32) -> (i32, i32) {
    %c0_i32 = arith.constant 0 : i32
    %c0_i32_0 = arith.constant 0 : i32
    %c0_i32_1 = arith.constant 0 : i32
    return %c0_i32, %c0_i32_0 : i32, i32
  }
  func.func @transform_4(%arg0: i32) -> (i32, i32) {
    %c0_i32 = arith.constant 0 : i32
    %c0_i32_0 = arith.constant 0 : i32
    %c0_i32_1 = arith.constant 0 : i32
    return %c0_i32, %c0_i32_0 : i32, i32
  }
  func.func @transform_5(%arg0: i32) -> (i32, i32) {
    %c0_i32 = arith.constant 0 : i32
    %c0_i32_0 = arith.constant 0 : i32
    %c0_i32_1 = arith.constant 0 : i32
    return %c0_i32, %c0_i32_0 : i32, i32
  }
  func.func @transform_6(%arg0: i32) -> (i32, i32) {
    %c0_i32 = arith.constant 0 : i32
    %c0_i32_0 = arith.constant 0 : i32
    %c0_i32_1 = arith.constant 0 : i32
    return %c0_i32, %c0_i32_0 : i32, i32
  }
  func.func @transform_7(%arg0: i32) -> (i32, i32) {
    %c0_i32 = arith.constant 0 : i32
    %c0_i32_0 = arith.constant 0 : i32
    %c0_i32_1 = arith.constant 0 : i32
    return %c0_i32, %c0_i32_0 : i32, i32
  }
  func.func @transform_8(%arg0: i32) -> (i32, i32) {
    %c0_i32 = arith.constant 0 : i32
    %c0_i32_0 = arith.constant 0 : i32
    %c0_i32_1 = arith.constant 0 : i32
    return %c0_i32, %c0_i32_0 : i32, i32
  }
  func.func @transform_9(%arg0: i32) -> (i32, i32) {
    %c0_i32 = arith.constant 0 : i32
    %c0_i32_0 = arith.constant 0 : i32
    %c0_i32_1 = arith.constant 0 : i32
    return %c0_i32, %c0_i32_0 : i32, i32
  }
  func.func @transform_10(%arg0: i32) -> (i32, i32) {
    %c0_i32 = arith.constant 0 : i32
    %c0_i32_0 = arith.constant 0 : i32
    return %arg0, %c0_i32 : i32, i32
  }
}

</mosaic_0001>

<bundles_post_ra>
// kernel: tpu_custom_call.1
= control target key start
LH: loop header
LB: loop body
LE: loop exit
PB: predicated region body
PF: predicated region fallthrough
CT: control target
= control target key end

     0   :  { %15 = vsyncpa [#allocation3], 0  ;;  %s1906_s0 = inlined_call_operand.hbm [shape: f32[8,32], index: 0, kind: input, shape index: {}]   ;;  %s1907_s1 = inlined_call_operand.hbm [shape: bf16[32,64], index: 1, kind: input, shape index: {}]   ;;  %s1908_s2 = inlined_call_operand.vmem [shape: f32[3,64], index: 2, kind: input, shape index: {}]   ;;  %s1909_s3 = inlined_call_operand.hbm [shape: f32[64,64], index: 3, kind: input, shape index: {}]   ;;  %s1910_s4 = inlined_call_operand.hbm [shape: bf16[64,128], index: 4, kind: input, shape index: {}]   ;;  %s1911_s5 = inlined_call_operand.vmem [shape: f32[3,128], index: 5, kind: input, shape index: {}]   ;;  %s1912_s6 = inlined_call_operand.hbm [shape: f32[128,128], index: 6, kind: input, shape index: {}]   ;;  %s1913_s7 = inlined_call_operand.hbm [shape: bf16[128,128], index: 7, kind: input, shape index: {}]   ;;  %s1914_s8 = inlined_call_operand.vmem [shape: f32[3,128], index: 8, kind: input, shape index: {}]   ;;  %s1915_s9 = inlined_call_operand.hbm [shape: f32[128,128], index: 9, kind: input, shape index: {}]   ;;  %s1916_s10 = inlined_call_operand.hbm [shape: f32[8,128], index: 10, kind: output, shape index: {}]  }
   0x1   :  { %16 = vsyncpa [#allocation6], 0 }
   0x2   :  { %17 = vsyncpa [#allocation9], 0 }
   0x3   :  { %18 = vsyncpa [#allocation12], 0 }
   0x4   :  { %19 = vsyncpa [#allocation4], 0  ;;  %s1603_s13 = smov [#allocation5]   ;;  %s1417_s17 = scalar_lea.hbm %s1907_s1, 256 }
   0x5   :  { %s35_s14 = sshll.u32 %s1603_s13, 4  ;;  %p1418_p0 = scmp.ne.s32.totalorder %s1907_s1, %s1417_s17  ;;  %s36_s14 = int_to_ptr.vmem [resolvable:$true] %s35_s14 }
   0x6   :  { %p1421_p1 = scmp.lt.u32.totalorder %s1417_s17, %s1907_s1 }
   0x8   :  { %p1423_p2 = pnand %p1421_p1, %p1418_p0 }
   0xa   :  { %1426 = shalt.err (!%p1423_p2)
}
   0xb   :  { %s1427_s22 = scalar_lea.vmem %s36_s14, 256  ;;  %p1432_p4 = scmp.lt.s32.totalorder %s36_s14, %s36_s14 }
   0xc   :  { %p1428_p3 = scmp.ne.s32.totalorder %s36_s14, %s1427_s22  ;;  %p1433_p5 = scmp.lt.s32.totalorder %s1427_s22, %s1427_s22 }
   0xe   :  { %p1434_p6 = por %p1433_p5, %p1432_p4 }
  0x10   :  { %p1435_p7 = pnand %p1434_p6, %p1428_p3 }
  0x12   :  { %1438 = shalt.err (!%p1435_p7)
}
  0x13   :  { %s1604_s23 = smov 64   ;;  %s1605_s24 = smov 4  }
  0x14   :  { %41 = dma.hbm_to_vmem [thread:$0]  %s1907_s1, 256, %s36_s14, [#allocation6], %s1604_s23, %s1604_s23, %s1605_s24  }
  0x15   :  { %s1606_s27 = smov [#allocation8]   ;;  %s1607_s29 = smov [#allocation11]  }
  0x16   :  { %s61_s28 = sshll.u32 %s1606_s27, 4  ;;  %s87_s30 = sshll.u32 %s1607_s29, 4  ;;  %s62_s28 = int_to_ptr.vmem [resolvable:$true] %s61_s28  ;;  %s88_s30 = int_to_ptr.vmem [resolvable:$true] %s87_s30 }
  0x17   :  { %s1439_s13 = scalar_lea.hbm %s1910_s4, 512 }
  0x18   :  { %p1440_p8 = scmp.ne.s32.totalorder %s1910_s4, %s1439_s13  ;;  %p1443_p9 = scmp.lt.u32.totalorder %s1439_s13, %s1910_s4 }
  0x1a   :  { %p1445_p10 = pnand %p1443_p9, %p1440_p8 }
  0x1c   :  { %1448 = shalt.err (!%p1445_p10)
}
  0x1d   :  { %s1449_s1 = scalar_lea.vmem %s62_s28, 512  ;;  %p1454_p12 = scmp.lt.s32.totalorder %s62_s28, %s62_s28 }
  0x1e   :  { %p1450_p11 = scmp.ne.s32.totalorder %s62_s28, %s1449_s1  ;;  %p1455_p13 = scmp.lt.s32.totalorder %s1449_s1, %s1449_s1 }
  0x20   :  { %p1456_p0 = por %p1455_p13, %p1454_p12 }
  0x22   :  { %p1457_p1 = pnand %p1456_p0, %p1450_p11 }
  0x24   :  { %1460 = shalt.err (!%p1457_p1)
}
  0x25   :  { %67 = dma.hbm_to_vmem [thread:$0]  %s1910_s4, 512, %s62_s28, [#allocation9], %s1604_s23, %s1604_s23, %s1605_s24  }
  0x26   :  { %s1461_s22 = scalar_lea.hbm %s1913_s7, 1024 }
  0x27   :  { %p1462_p2 = scmp.ne.s32.totalorder %s1913_s7, %s1461_s22  ;;  %p1465_p3 = scmp.lt.u32.totalorder %s1461_s22, %s1913_s7 }
  0x29   :  { %p1467_p4 = pnand %p1465_p3, %p1462_p2 }
  0x2b   :  { %1470 = shalt.err (!%p1467_p4)
}
  0x2c   :  { %s1471_s11 = scalar_lea.vmem %s88_s30, 1024  ;;  %p1476_p6 = scmp.lt.s32.totalorder %s88_s30, %s88_s30 }
  0x2d   :  { %p1472_p5 = scmp.ne.s32.totalorder %s88_s30, %s1471_s11  ;;  %p1477_p7 = scmp.lt.s32.totalorder %s1471_s11, %s1471_s11 }
  0x2f   :  { %p1478_p8 = por %p1477_p7, %p1476_p6 }
  0x31   :  { %p1479_p9 = pnand %p1478_p8, %p1472_p5 }
  0x33   :  { %1482 = shalt.err (!%p1479_p9)
}
  0x34   :  { %93 = dma.hbm_to_vmem [thread:$0]  %s1913_s7, 1024, %s88_s30, [#allocation12], %s1604_s23, %s1604_s23, %s1605_s24  }
  0x35   :  { %s1608_s12 = smov [#allocation2]   ;;  %s1609_s15 = smov [#allocation7]  }
  0x36   :  { %s26_s13 = sshll.u32 %s1608_s12, 4  ;;  %s49_s16 = sshll.u32 %s1609_s15, 4  ;;  %s27_s13 = int_to_ptr.vmem [resolvable:$true] %s26_s13  ;;  %s50_s16 = int_to_ptr.vmem [resolvable:$true] %s49_s16 }
  0x37   :  { %s1483_s1 = scalar_lea.hbm %s1906_s0, 128 }
  0x38   :  { %p1484_p10 = scmp.ne.s32.totalorder %s1906_s0, %s1483_s1  ;;  %p1487_p11 = scmp.lt.u32.totalorder %s1483_s1, %s1906_s0 }
  0x3a   :  { %p1489_p12 = pnand %p1487_p11, %p1484_p10 }
  0x3c   :  { %1492 = shalt.err (!%p1489_p12)
}
  0x3d   :  { %s1493_s7 = scalar_lea.vmem %s27_s13, 128  ;;  %p1498_p0 = scmp.lt.s32.totalorder %s27_s13, %s27_s13 }
  0x3e   :  { %p1494_p13 = scmp.ne.s32.totalorder %s27_s13, %s1493_s7  ;;  %p1499_p1 = scmp.lt.s32.totalorder %s1493_s7, %s1493_s7 }
  0x40   :  { %p1500_p2 = por %p1499_p1, %p1498_p0 }
  0x42   :  { %p1501_p3 = pnand %p1500_p2, %p1494_p13 }
  0x44   :  { %1504 = shalt.err (!%p1501_p3)
}
  0x45   :  { %29 = dma.hbm_to_vmem [thread:$0]  %s1906_s0, 128, %s27_s13, [#allocation3]  }
  0x46   :  { %s1505_s25 = scalar_lea.hbm %s1909_s3, 1024 }
  0x47   :  { %p1506_p4 = scmp.ne.s32.totalorder %s1909_s3, %s1505_s25  ;;  %p1509_p5 = scmp.lt.u32.totalorder %s1505_s25, %s1909_s3 }
  0x49   :  { %p1511_p6 = pnand %p1509_p5, %p1506_p4 }
  0x4b   :  { %1514 = shalt.err (!%p1511_p6)
}
  0x4c   :  { %s1515_s4 = scalar_lea.vmem %s50_s16, 1024  ;;  %p1520_p8 = scmp.lt.s32.totalorder %s50_s16, %s50_s16 }
  0x4d   :  { %p1516_p7 = scmp.ne.s32.totalorder %s50_s16, %s1515_s4  ;;  %p1521_p9 = scmp.lt.s32.totalorder %s1515_s4, %s1515_s4 }
  0x4f   :  { %p1522_p10 = por %p1521_p9, %p1520_p8 }
  0x51   :  { %p1523_p11 = pnand %p1522_p10, %p1516_p7 }
  0x53   :  { %1526 = shalt.err (!%p1523_p11)
}
  0x54   :  { %s1610_s0 = smov 128   ;;  %s1611_s28 = smov 8  }
  0x55   :  { %55 = dma.hbm_to_vmem [thread:$0]  %s1909_s3, 1024, %s50_s16, [#allocation6], %s1610_s0, %s1610_s0, %s1611_s28  }
  0x56   :  { %s1612_s15 = smov [#allocation10]   ;;  %s1613_s18 = smov [#allocation13]  }
  0x57   :  { %s75_s17 = sshll.u32 %s1612_s15, 4  ;;  %s101_s1 = sshll.u32 %s1613_s18, 4  ;;  %s76_s17 = int_to_ptr.vmem [resolvable:$true] %s75_s17  ;;  %s102_s1 = int_to_ptr.vmem [resolvable:$true] %s101_s1 }
  0x58   :  { %s1527_s20 = scalar_lea.hbm %s1912_s6, 2048 }
  0x59   :  { %p1528_p12 = scmp.ne.s32.totalorder %s1912_s6, %s1527_s20  ;;  %p1531_p13 = scmp.lt.u32.totalorder %s1527_s20, %s1912_s6 }
  0x5b   :  { %p1533_p0 = pnand %p1531_p13, %p1528_p12 }
  0x5d   :  { %1536 = shalt.err (!%p1533_p0)
}
  0x5e   :  { %s1537_s3 = scalar_lea.vmem %s76_s17, 2048  ;;  %p1542_p2 = scmp.lt.s32.totalorder %s76_s17, %s76_s17 }
  0x5f   :  { %p1538_p1 = scmp.ne.s32.totalorder %s76_s17, %s1537_s3  ;;  %p1543_p3 = scmp.lt.s32.totalorder %s1537_s3, %s1537_s3 }
  0x61   :  { %p1544_p4 = por %p1543_p3, %p1542_p2 }
  0x63   :  { %p1545_p5 = pnand %p1544_p4, %p1538_p1 }
  0x65   :  { %1548 = shalt.err (!%p1545_p5)
}
  0x66   :  { %81 = dma.hbm_to_vmem [thread:$0]  %s1912_s6, 2048, %s76_s17, [#allocation9], %s1610_s0, %s1610_s0, %s1611_s28  }
  0x67   :  { %s1549_s26 = scalar_lea.hbm %s1915_s9, 2048 }
  0x68   :  { %p1550_p6 = scmp.ne.s32.totalorder %s1915_s9, %s1549_s26  ;;  %p1553_p7 = scmp.lt.u32.totalorder %s1549_s26, %s1915_s9 }
  0x6a   :  { %p1555_p8 = pnand %p1553_p7, %p1550_p6 }
  0x6c   :  { %1558 = shalt.err (!%p1555_p8)
}
  0x6d   :  { %s1559_s12 = scalar_lea.vmem %s102_s1, 2048  ;;  %p1564_p10 = scmp.lt.s32.totalorder %s102_s1, %s102_s1 }
  0x6e   :  { %p1560_p9 = scmp.ne.s32.totalorder %s102_s1, %s1559_s12  ;;  %p1565_p11 = scmp.lt.s32.totalorder %s1559_s12, %s1559_s12 }
  0x70   :  { %p1566_p12 = por %p1565_p11, %p1564_p10 }
  0x72   :  { %p1567_p13 = pnand %p1566_p12, %p1560_p9 }
  0x74   :  { %1570 = shalt.err (!%p1567_p13)
}
  0x75   :  { %107 = dma.hbm_to_vmem [thread:$0]  %s1915_s9, 2048, %s102_s1, [#allocation12], %s1610_s0, %s1610_s0, %s1611_s28  }
  0x76   :  { %1593 = dma.done.wait [#allocation3], 128  }
  0x77   :  { %1594 = vsyncadd [#allocation3], 4294967168 }
  0x78   :  { %1595 = dma.done.wait [#allocation6], 1280  }
  0x79   :  { %1596 = vsyncadd [#allocation6], 4294966016 }
  0x7a   :  { %1597 = dma.done.wait [#allocation9], 2560  }
  0x7b   :  { %1598 = vsyncadd [#allocation9], 4294964736 }
  0x7c   :  { %1599 = dma.done.wait [#allocation12], 3072  }
  0x7d   :  { %1600 = vsyncadd [#allocation12], 4294964224  ;;  %v1614_v0 = vmov 0.0   ;;  %vm1615_vm0 = vmmov 0   ;;  %v1616_v1 = vmov 0.0|0.0   ;;  %v1395_v2 = vld [vmem:[#allocation5] sm:$0xff]   ;;  %v137_v18 = vlaneseq }
  0x7e   :  { %1042 = vmatprep.subr.bf16.mxu1 %v1614_v0  ;;  %1046 = vmatprep.mubr.msk.bf16.mxu1 %vm1615_vm0, %v1614_v0  ;;  %v1396_v3 = vld [vmem:[#allocation5 + $0x8] sm:$0xff]   ;;  %v130_v4 = vld [vmem:[#allocation2] sm:$0xff]  ;;  %v197_v5 = vld [vmem:[#allocation7] sm:$0xff]  ;;  %vm153_vm1 = vcmask 261120   ;;  %vm205_vm2 = vcmask 523264  }
  0x7f   :  { %1272 = vmatprep.subr.bf16.mxu0 %v1616_v1  ;;  %1085 = vmatprep.mubr.msk.f32.mxu0 %vm1615_vm0, %v1614_v0  ;;  %v198_v6 = vld [vmem:[#allocation7 + $0x8] sm:$0xff]  ;;  %v199_v8 = vld [vmem:[#allocation7 + $0x10] sm:$0xff]  ;;  %v200_v9 = vld [vmem:[#allocation7 + $0x18] sm:$0xff]  ;;  %v132_v10 = vpack.c.bf16 %v130_v4, %v130_v4  ;;  %v1793_v19 = vshrl.u32 %v137_v18, 7 }
  0x80   :  { %1043 = vmatpush3.bf16.msra.mxu1 %v1395_v2  ;;  %v1261_v7 = vpack.c.bf16 %v198_v6, %v197_v5  ;;  %v201_v11 = vld [vmem:[#allocation7 + $0x20] sm:$0xff]  ;;  %v202_v12 = vld [vmem:[#allocation7 + $0x28] sm:$0xff]  ;;  %v1264_v13 = vpack.c.bf16 %v200_v9, %v199_v8  ;;  %v203_v15 = vld [vmem:[#allocation7 + $0x30] sm:$0xff] }
  0x81   :  { %1044 = vmatprep.subr.bf16.mxu1 %v1614_v0  ;;  %v1267_v14 = vpack.c.bf16 %v202_v12, %v201_v11  ;;  %v204_v16 = vld [vmem:[#allocation7 + $0x38] sm:$0xff]  ;;  %v1796_v20 = vsub.s32 0, %v1793_v19  ;;  %v1801_v21 = vld [vmem:[%s1908_s2] sm:$0x7]  ;;  %v1397_v32 = vld [vmem:[#allocation8] sm:$0xff]   ;;  %v1823_v60 = vsub.s32 1, %v1793_v19 }
  0x82   :  { %1274 = vmatpush3.bf16.msra.mxu0 %v1261_v7  ;;  %v1270_v17 = vpack.c.bf16 %v204_v16, %v203_v15  ;;  %v1398_v33 = vld [vmem:[#allocation8 + $0x8] sm:$0xff]   ;;  %v1399_v34 = vld [vmem:[#allocation8 + $0x10] sm:$0xff]   ;;  %v1400_v35 = vld [vmem:[#allocation8 + $0x18] sm:$0xff]   ;;  %v1828_v62 = vsub.s32 2, %v1793_v19 }
  0x83   :  { %1275 = vmatprep.subr.bf16.mxu0 %v1616_v1  ;;  %v140_v22 = vrot.slane %v1801_v21, %v1796_v20  ;;  %v449_v36 = vld [vmem:[#allocation10] sm:$0xff]  ;;  %v450_v37 = vld [vmem:[#allocation10 + $0x8] sm:$0xff]  ;;  %v451_v38 = vld [vmem:[#allocation10 + $0x10] sm:$0xff]  ;;  %v358_v61 = vrot.slane %v1801_v21, %v1823_v60 }
  0x84   :  { %1045 = vmatpush3.bf16.msra.mxu1 %v1396_v3  ;;  %v1285_v39 = vpack.c.bf16 %v450_v37, %v449_v36  ;;  %v452_v40 = vld [vmem:[#allocation10 + $0x18] sm:$0xff]  ;;  %v453_v42 = vld [vmem:[#allocation10 + $0x20] sm:$0xff]  ;;  %v454_v43 = vld [vmem:[#allocation10 + $0x28] sm:$0xff]  ;;  %v364_v2 = vrot.slane %v1801_v21, %v1828_v62 }
  0x85   :  { %1260 = vmatprep.subr.bf16.mxu1 %v1616_v1  ;;  %v1288_v41 = vpack.c.bf16 %v452_v40, %v451_v38  ;;  %v1291_v44 = vpack.c.bf16 %v454_v43, %v453_v42  ;;  %v455_v45 = vld [vmem:[#allocation10 + $0x30] sm:$0xff]  ;;  %v456_v46 = vld [vmem:[#allocation10 + $0x38] sm:$0xff]  ;;  %v457_v48 = vld [vmem:[#allocation10 + $0x40] sm:$0xff] }
  0x86   :  { %1277 = vmatpush3.bf16.msra.mxu0 %v1264_v13  ;;  %v1294_v47 = vpack.c.bf16 %v456_v46, %v455_v45  ;;  %v458_v49 = vld [vmem:[#allocation10 + $0x48] sm:$0xff]  ;;  %v459_v51 = vld [vmem:[#allocation10 + $0x50] sm:$0xff]  ;;  %v460_v52 = vld [vmem:[#allocation10 + $0x58] sm:$0xff] }
  0x87   :  { %1047 = vmatmul.mubr.msk.bf16.vlgmr.msra.gmra.mrb[0].mxu1 %vm153_vm1, %v132_v10  ;;  %1278 = vmatprep.subr.bf16.mxu0 %v1616_v1  ;;  %v1297_v50 = vpack.c.bf16 %v458_v49, %v457_v48  ;;  %v1300_v53 = vpack.c.bf16 %v460_v52, %v459_v51  ;;  %v461_v54 = vld [vmem:[#allocation10 + $0x60] sm:$0xff]  ;;  %v462_v55 = vld [vmem:[#allocation10 + $0x68] sm:$0xff]  ;;  %v463_v9 = vld [vmem:[#allocation10 + $0x70] sm:$0xff] }
  0x88   :  { %1262 = vmatpush3.bf16.msra.mxu1 %v1261_v7  ;;  %1066 = vmatprep.mubr.msk.f32.mxu1 %vm1615_vm0, %v1614_v0  ;;  %v1303_v56 = vpack.c.bf16 %v462_v55, %v461_v54  ;;  %v464_v10 = vld [vmem:[#allocation10 + $0x78] sm:$0xff]  ;;  %v1847_v12 = vld [vmem:[%s1911_s5] sm:$0x7]  ;;  %v1401_v19 = vld [vmem:[#allocation11] sm:$0xff]  }
  0x89   :  { %1263 = vmatprep.subr.bf16.mxu1 %v1616_v1  ;;  %v1306_v11 = vpack.c.bf16 %v464_v10, %v463_v9  ;;  %v1402_v21 = vld [vmem:[#allocation11 + $0x8] sm:$0xff]   ;;  %v734_v36 = vld [vmem:[#allocation13 + $0x18] sm:$0xff]  ;;  %v735_v38 = vld [vmem:[#allocation13 + $0x20] sm:$0xff] }
  0x8a   :  { %1280 = vmatpush3.bf16.msra.mxu0 %v1267_v14  ;;  %v738_v42 = vld [vmem:[#allocation13 + $0x38] sm:$0xff]  ;;  %v740_v45 = vld [vmem:[#allocation13 + $0x48] sm:$0xff] }
  0x8b   :  { %1281 = vmatprep.subr.bf16.mxu0 %v1616_v1  ;;  %v742_v48 = vld [vmem:[#allocation13 + $0x58] sm:$0xff]  ;;  %v744_v51 = vld [vmem:[#allocation13 + $0x68] sm:$0xff] }
  0x8c   :  { %1265 = vmatpush3.bf16.msra.mxu1 %v1264_v13  ;;  %v381_v13 = vrot.slane %v1847_v12, %v1796_v20 }
  0x8d   :  { %1266 = vmatprep.subr.bf16.mxu1 %v1616_v1 }
  0x8e   :  { %1283 = vmatpush3.bf16.msra.mxu0 %v1270_v17 }
  0x8f   :  { %1284 = vmatprep.subr.bf16.mxu0 %v1616_v1 }
  0x90   :  { %1268 = vmatpush3.bf16.msra.mxu1 %v1267_v14 }
  0x91   :  { %1269 = vmatprep.subr.bf16.mxu1 %v1616_v1 }
  0x94   :  { %1271 = vmatpush3.bf16.msra.mxu1 %v1270_v17 }
  0x95   :  { %1088 = vmatprep.subr.bf16.mxu1 %v1614_v0 }
 0x15a   :  { %v191_v23 = vpop.f32.mrb[0].mxu1 }
 0x15b   :  { %v192_v24 = vadd.f32 %v191_v23, %v140_v22  ;;  %v1048_v25 = vpop.f32.mrb[1].mxu1 }
 0x15c   :  { %v194_v26 = vpop.f32.mrb[2].mxu1 }
 0x15d   :  { %v1049_v27 = vpop.f32.mrb[3].mxu1  ;;  %1067 = vmatmul.mubr.msk.f32.vlgmr.msra.gmra.mrb[4].mxu1 %vm205_vm2, %v192_v24  ;;  %v1403_v26 = vld [vmem:[#allocation11 + $0x10] sm:$0xff]  }
 0x15e   :  { %1096 = vmatprep.mubr.msk.bf16.mxu1 %vm1615_vm0, %v1614_v0  ;;  %1089 = vmatpush3.bf16.msra.mxu1 %v1397_v32  ;;  %v1404_v27 = vld [vmem:[#allocation11 + $0x18] sm:$0xff]   ;;  %v731_v32 = vld [vmem:[#allocation13] sm:$0xff] }
 0x15f   :  { %1090 = vmatprep.subr.bf16.mxu1 %v1614_v0 }
 0x162   :  { %1091 = vmatpush3.bf16.msra.mxu1 %v1398_v33  ;;  %v732_v33 = vld [vmem:[#allocation13 + $0x8] sm:$0xff] }
 0x163   :  { %1092 = vmatprep.subr.bf16.mxu1 %v1614_v0 }
 0x166   :  { %1093 = vmatpush3.bf16.msra.mxu1 %v1399_v34  ;;  %v733_v34 = vld [vmem:[#allocation13 + $0x10] sm:$0xff] }
 0x167   :  { %1094 = vmatprep.subr.bf16.mxu1 %v1614_v0  ;;  %v1336_v37 = vpack.c.bf16 %v734_v36, %v733_v34 }
 0x16a   :  { %1095 = vmatpush3.bf16.msra.mxu1 %v1400_v35  ;;  %v1333_v35 = vpack.c.bf16 %v732_v33, %v731_v32 }
 0x16b   :  { %1308 = vmatprep.subr.bf16.mxu1 %v1616_v1 }
 0x230   :  { %v275_v28 = vpop.f32.mrb[4].mxu1 }
 0x231   :  { %v279_v29 = vsub.f32 %v192_v24, %v275_v28  ;;  %v1068_v30 = vpop.f32.mrb[5].mxu1  ;;  %v1405_v28 = vld [vmem:[#allocation11 + $0x20] sm:$0xff]  }
 0x232   :  { %v1407_v30 = vld [vmem:[#allocation11 + $0x30] sm:$0xff]  }
 0x233   :  { %v280_v31 = vmul.f32 %v279_v29, %v279_v29 }
 0x235   :  { %1086 = vmatmul.mubr.msk.f32.vlgmr.msra.gmra.mrb[0].mxu0 %vm205_vm2, %v280_v31  ;;  %v1408_v31 = vld [vmem:[#allocation11 + $0x38] sm:$0xff]  }
 0x236   :  { %1132 = vmatprep.mubr.msk.f32.mxu0 %vm1615_vm0, %v1614_v0  ;;  %1286 = vmatpush3.bf16.msra.mxu0 %v1285_v39 }
 0x237   :  { %1287 = vmatprep.subr.bf16.mxu0 %v1616_v1 }
 0x23a   :  { %1289 = vmatpush3.bf16.msra.mxu0 %v1288_v41 }
 0x23b   :  { %1290 = vmatprep.subr.bf16.mxu0 %v1616_v1 }
 0x23e   :  { %1292 = vmatpush3.bf16.msra.mxu0 %v1291_v44 }
 0x23f   :  { %1293 = vmatprep.subr.bf16.mxu0 %v1616_v1 }
 0x242   :  { %1295 = vmatpush3.bf16.msra.mxu0 %v1294_v47 }
 0x243   :  { %1296 = vmatprep.subr.bf16.mxu0 %v1616_v1 }
 0x246   :  { %1298 = vmatpush3.bf16.msra.mxu0 %v1297_v50 }
 0x247   :  { %1299 = vmatprep.subr.bf16.mxu0 %v1616_v1 }
 0x24a   :  { %1301 = vmatpush3.bf16.msra.mxu0 %v1300_v53 }
 0x24b   :  { %1302 = vmatprep.subr.bf16.mxu0 %v1616_v1 }
 0x24e   :  { %1304 = vmatpush3.bf16.msra.mxu0 %v1303_v56 }
 0x24f   :  { %1305 = vmatprep.subr.bf16.mxu0 %v1616_v1 }
 0x252   :  { %1307 = vmatpush3.bf16.msra.mxu0 %v1306_v11 }
 0x253   :  { %1170 = vmatprep.subr.bf16.mxu0 %v1614_v0 }
 0x308   :  { %v350_v57 = vpop.f32.mrb[0].mxu0 }
 0x309   :  { %v351_v58 = vadd.f32 1e-05, %v350_v57  ;;  %v1087_v59 = vpop.f32.mrb[1].mxu0 }
 0x30b   :  { %1409 = vrsqrt.f32 %v351_v58  ;;  %v617_v58 = vrot.slane %v1847_v12, %v1828_v62 }
 0x315   :  { %v1410_v63 = vpop.eup %1409 }
 0x316   :  { %v359_v3 = vmul.f32 %v1410_v63, %v358_v61 }
 0x318   :  { %v360_v4 = vmul.f32 %v359_v3, %v279_v29  ;;  %v1406_v29 = vld [vmem:[#allocation11 + $0x28] sm:$0xff]  }
 0x31a   :  { %v365_v5 = vadd.f32 %v364_v2, %v360_v4 }
 0x31c   :  { %v366_v6 = vmul.f32 0.02, %v365_v5 }
 0x31e   :  { %v367_v7 = vmax.f32 %v365_v5, %v366_v6  ;;  %v746_v5 = vld [vmem:[#allocation13 + $0x78] sm:$0xff] }
 0x320   :  { %v369_v8 = vpack.c.bf16 %v367_v7, %v367_v7  ;;  %v621_v7 = vld [vmem:[%s1914_s8] sm:$0x7]  ;;  %s1617_s8 = smov [#allocation14]  }
 0x321   :  { %s909_s17 = sshll.u32 %s1617_s8, 4  ;;  %s910_s17 = int_to_ptr.vmem [resolvable:$true] %s909_s17 }
 0x322   :  { %1097 = vmatmul.mubr.msk.bf16.vlgmr.msra.gmra.mrb[8].mxu1 %vm205_vm2, %v369_v8  ;;  %v642_v8 = vrot.slane %v621_v7, %v1796_v20  ;;  %v899_v20 = vrot.slane %v621_v7, %v1828_v62  ;;  %s1571_s18 = scalar_lea.vmem %s910_s17, 128  ;;  %p1576_p1 = scmp.lt.s32.totalorder %s910_s17, %s910_s17 }
 0x323   :  { %1310 = vmatpush3.bf16.msra.mxu1 %v1285_v39  ;;  %1167 = vmatprep.mubr.msk.f32.mxu1 %vm1615_vm0, %v1614_v0  ;;  %v736_v39 = vld [vmem:[#allocation13 + $0x28] sm:$0xff]  ;;  %p1572_p0 = scmp.ne.s32.totalorder %s910_s17, %s1571_s18  ;;  %p1577_p2 = scmp.lt.s32.totalorder %s1571_s18, %s1571_s18 }
 0x324   :  { %1311 = vmatprep.subr.bf16.mxu1 %v1616_v1  ;;  %v1339_v40 = vpack.c.bf16 %v736_v39, %v735_v38 }
 0x325   :  { %p1578_p3 = por %p1577_p2, %p1576_p1 }
 0x327   :  { %1313 = vmatpush3.bf16.msra.mxu1 %v1288_v41  ;;  %v737_v41 = vld [vmem:[#allocation13 + $0x30] sm:$0xff]  ;;  %p1579_p4 = pnand %p1578_p3, %p1572_p0 }
 0x328   :  { %1314 = vmatprep.subr.bf16.mxu1 %v1616_v1  ;;  %v1342_v43 = vpack.c.bf16 %v738_v42, %v737_v41 }
 0x32b   :  { %1316 = vmatpush3.bf16.msra.mxu1 %v1291_v44  ;;  %v739_v44 = vld [vmem:[#allocation13 + $0x40] sm:$0xff] }
 0x32c   :  { %1317 = vmatprep.subr.bf16.mxu1 %v1616_v1  ;;  %v1345_v46 = vpack.c.bf16 %v740_v45, %v739_v44 }
 0x32f   :  { %1319 = vmatpush3.bf16.msra.mxu1 %v1294_v47  ;;  %v741_v47 = vld [vmem:[#allocation13 + $0x50] sm:$0xff] }
 0x330   :  { %1320 = vmatprep.subr.bf16.mxu1 %v1616_v1  ;;  %v1348_v49 = vpack.c.bf16 %v742_v48, %v741_v47 }
 0x333   :  { %1322 = vmatpush3.bf16.msra.mxu1 %v1297_v50  ;;  %v743_v50 = vld [vmem:[#allocation13 + $0x60] sm:$0xff] }
 0x334   :  { %1323 = vmatprep.subr.bf16.mxu1 %v1616_v1  ;;  %v1351_v52 = vpack.c.bf16 %v744_v51, %v743_v50 }
 0x337   :  { %1325 = vmatpush3.bf16.msra.mxu1 %v1300_v53 }
 0x338   :  { %1326 = vmatprep.subr.bf16.mxu1 %v1616_v1 }
 0x33b   :  { %1328 = vmatpush3.bf16.msra.mxu1 %v1303_v56  ;;  %v611_v56 = vrot.slane %v1847_v12, %v1823_v60 }
 0x33c   :  { %1329 = vmatprep.subr.bf16.mxu1 %v1616_v1 }
 0x33f   :  { %1331 = vmatpush3.bf16.msra.mxu1 %v1306_v11 }
 0x340   :  { %1332 = vmatprep.subr.bf16.mxu1 %v1616_v1 }
 0x3f5   :  { %v443_v14 = vpop.f32.mrb[8].mxu1 }
 0x3f6   :  { %v444_v15 = vadd.f32 %v443_v14, %v381_v13  ;;  %v1098_v16 = vpop.f32.mrb[9].mxu1 }
 0x3f7   :  { %v446_v17 = vpop.f32.mrb[10].mxu1 }
 0x3f8   :  { %v1099_v18 = vpop.f32.mrb[11].mxu1  ;;  %1133 = vmatmul.mubr.f32.vlgmr.msra.gmra.mrb[2].mxu0 %v444_v15 }
 0x3f9   :  { %1186 = vmatprep.mubr.msk.bf16.mxu0 %vm1615_vm0, %v1614_v0  ;;  %1171 = vmatpush3.bf16.msra.mxu0 %v1401_v19 }
 0x3fa   :  { %1172 = vmatprep.subr.bf16.mxu0 %v1614_v0 }
 0x3fd   :  { %1173 = vmatpush3.bf16.msra.mxu0 %v1402_v21  ;;  %v893_v21 = vrot.slane %v621_v7, %v1823_v60 }
 0x3fe   :  { %1174 = vmatprep.subr.bf16.mxu0 %v1614_v0 }
 0x401   :  { %1175 = vmatpush3.bf16.msra.mxu0 %v1403_v26 }
 0x402   :  { %1176 = vmatprep.subr.bf16.mxu0 %v1614_v0 }
 0x405   :  { %1177 = vmatpush3.bf16.msra.mxu0 %v1404_v27 }
 0x406   :  { %1178 = vmatprep.subr.bf16.mxu0 %v1614_v0 }
 0x409   :  { %1179 = vmatpush3.bf16.msra.mxu0 %v1405_v28 }
 0x40a   :  { %1180 = vmatprep.subr.bf16.mxu0 %v1614_v0 }
 0x40d   :  { %1181 = vmatpush3.bf16.msra.mxu0 %v1406_v29 }
 0x40e   :  { %1182 = vmatprep.subr.bf16.mxu0 %v1614_v0 }
 0x411   :  { %1183 = vmatpush3.bf16.msra.mxu0 %v1407_v30 }
 0x412   :  { %1184 = vmatprep.subr.bf16.mxu0 %v1614_v0 }
 0x415   :  { %1185 = vmatpush3.bf16.msra.mxu0 %v1408_v31 }
 0x416   :  { %1356 = vmatprep.subr.bf16.mxu0 %v1616_v1 }
 0x4cb   :  { %v531_v22 = vpop.f32.mrb[2].mxu0 }
 0x4cc   :  { %v1855_v23 = vsub.f32 %v444_v15, %v531_v22  ;;  %v1134_v24 = vpop.f32.mrb[3].mxu0 }
 0x4ce   :  { %v536_v25 = vmul.f32 %v1855_v23, %v1855_v23 }
 0x4d0   :  { %1168 = vmatmul.mubr.f32.vlgmr.msra.gmra.mrb[6].mxu1 %v536_v25 }
 0x4d1   :  { %1222 = vmatprep.mubr.msk.f32.mxu1 %vm1615_vm0, %v1614_v0  ;;  %1334 = vmatpush3.bf16.msra.mxu1 %v1333_v35 }
 0x4d2   :  { %1335 = vmatprep.subr.bf16.mxu1 %v1616_v1 }
 0x4d5   :  { %1337 = vmatpush3.bf16.msra.mxu1 %v1336_v37 }
 0x4d6   :  { %1338 = vmatprep.subr.bf16.mxu1 %v1616_v1 }
 0x4d9   :  { %1340 = vmatpush3.bf16.msra.mxu1 %v1339_v40 }
 0x4da   :  { %1341 = vmatprep.subr.bf16.mxu1 %v1616_v1 }
 0x4dd   :  { %1343 = vmatpush3.bf16.msra.mxu1 %v1342_v43 }
 0x4de   :  { %1344 = vmatprep.subr.bf16.mxu1 %v1616_v1 }
 0x4e1   :  { %1346 = vmatpush3.bf16.msra.mxu1 %v1345_v46 }
 0x4e2   :  { %1347 = vmatprep.subr.bf16.mxu1 %v1616_v1 }
 0x4e5   :  { %1349 = vmatpush3.bf16.msra.mxu1 %v1348_v49 }
 0x4e6   :  { %1350 = vmatprep.subr.bf16.mxu1 %v1616_v1 }
 0x4e9   :  { %1352 = vmatpush3.bf16.msra.mxu1 %v1351_v52 }
 0x4ea   :  { %1353 = vmatprep.subr.bf16.mxu1 %v1616_v1 }
 0x5a3   :  { %v603_v53 = vpop.f32.mrb[6].mxu1 }
 0x5a4   :  { %v604_v54 = vadd.f32 1e-05, %v603_v53  ;;  %v1169_v55 = vpop.f32.mrb[7].mxu1 }
 0x5a6   :  { %1411 = vrsqrt.f32 %v604_v54 }
 0x5b0   :  { %v1412_v57 = vpop.eup %1411 }
 0x5b1   :  { %v612_v59 = vmul.f32 %v1412_v57, %v611_v56 }
 0x5b3   :  { %v613_v61 = vmul.f32 %v612_v59, %v1855_v23 }
 0x5b5   :  { %v618_v63 = vadd.f32 %v617_v58, %v613_v61 }
 0x5b7   :  { %v619_v2 = vmul.f32 0.02, %v618_v63 }
 0x5b9   :  { %v620_v3 = vmax.f32 %v618_v63, %v619_v2 }
 0x5bb   :  { %v622_v4 = vpack.c.bf16 %v620_v3, %v620_v3 }
 0x5bd   :  { %1187 = vmatmul.mubr.bf16.vlgmr.msra.gmra.mrb[4].mxu0 %v622_v4 }
 0x5be   :  { %1358 = vmatpush3.bf16.msra.mxu0 %v1333_v35  ;;  %1257 = vmatprep.mubr.msk.f32.mxu0 %vm1615_vm0, %v1614_v0  ;;  %v745_v0 = vld [vmem:[#allocation13 + $0x70] sm:$0xff] }
 0x5bf   :  { %1359 = vmatprep.subr.bf16.mxu0 %v1616_v1  ;;  %v1354_v6 = vpack.c.bf16 %v746_v5, %v745_v0 }
 0x5c1   :  { %1355 = vmatpush3.bf16.msra.mxu1 %v1354_v6 }
 0x5c2   :  { %1361 = vmatpush3.bf16.msra.mxu0 %v1336_v37 }
 0x5c3   :  { %1362 = vmatprep.subr.bf16.mxu0 %v1616_v1 }
 0x5c6   :  { %1364 = vmatpush3.bf16.msra.mxu0 %v1339_v40 }
 0x5c7   :  { %1365 = vmatprep.subr.bf16.mxu0 %v1616_v1 }
 0x5ca   :  { %1367 = vmatpush3.bf16.msra.mxu0 %v1342_v43 }
 0x5cb   :  { %1368 = vmatprep.subr.bf16.mxu0 %v1616_v1 }
 0x5ce   :  { %1370 = vmatpush3.bf16.msra.mxu0 %v1345_v46 }
 0x5cf   :  { %1371 = vmatprep.subr.bf16.mxu0 %v1616_v1 }
 0x5d2   :  { %1373 = vmatpush3.bf16.msra.mxu0 %v1348_v49 }
 0x5d3   :  { %1374 = vmatprep.subr.bf16.mxu0 %v1616_v1 }
 0x5d6   :  { %1376 = vmatpush3.bf16.msra.mxu0 %v1351_v52 }
 0x5d7   :  { %1377 = vmatprep.subr.bf16.mxu0 %v1616_v1 }
 0x5da   :  { %1379 = vmatpush3.bf16.msra.mxu0 %v1354_v6 }
 0x690   :  { %v725_v9 = vpop.f32.mrb[4].mxu0 }
 0x691   :  { %v726_v10 = vadd.f32 %v725_v9, %v642_v8  ;;  %v1188_v11 = vpop.f32.mrb[5].mxu0 }
 0x692   :  { %v728_v12 = vpop.f32.mrb[6].mxu0 }
 0x693   :  { %v1189_v13 = vpop.f32.mrb[7].mxu0  ;;  %1223 = vmatmul.mubr.f32.vlgmr.msra.gmra.mrb[12].mxu1 %v726_v10 }
 0x766   :  { %v813_v14 = vpop.f32.mrb[12].mxu1 }
 0x767   :  { %v817_v15 = vsub.f32 %v726_v10, %v813_v14  ;;  %v1224_v1 = vpop.f32.mrb[13].mxu1 }
 0x769   :  { %v818_v16 = vmul.f32 %v817_v15, %v817_v15 }
 0x76b   :  { %1258 = vmatmul.mubr.f32.vlgmr.msra.gmra.mrb[8].mxu0 %v818_v16 }
 0x83e   :  { %v885_v17 = vpop.f32.mrb[8].mxu0 }
 0x83f   :  { %v886_v18 = vadd.f32 1e-05, %v885_v17  ;;  %v1259_v19 = vpop.f32.mrb[9].mxu0 }
 0x841   :  { %1413 = vrsqrt.f32 %v886_v18 }
 0x84b   :  { %v1414_v22 = vpop.eup %1413 }
 0x84c   :  { %v894_v23 = vmul.f32 %v1414_v22, %v893_v21 }
 0x84e   :  { %v895_v24 = vmul.f32 %v894_v23, %v817_v15 }
 0x850   :  { %v900_v25 = vadd.f32 %v899_v20, %v895_v24 }
 0x852   :  { %1415 = vtanh.f32 %v900_v25 }
 0x85c   :  { %v1416_v26 = vpop.eup %1415 }
 0x85d   :  { %902 = vst [vmem:[#allocation14] sm:$0xff] %v1416_v26 }
 0x85e   :  { %1582 = shalt.err (!%p1579_p4)
}
 0x85f   :  { %s1583_s19 = scalar_lea.hbm %s1916_s10, 128 }
 0x860   :  { %p1584_p5 = scmp.ne.s32.totalorder %s1916_s10, %s1583_s19  ;;  %p1587_p6 = scmp.lt.u32.totalorder %s1583_s19, %s1916_s10 }
 0x862   :  { %p1589_p7 = pnand %p1587_p6, %p1584_p5 }
 0x864   :  { %1592 = shalt.err (!%p1589_p7)
}
 0x865   :  { %912 = dma.vmem_to_hbm [thread:$0]  %s910_s17, 128, %s1916_s10, [#allocation4]  }
 0x866   :  { %1601 = dma.done.wait [#allocation4], 128  }
 0x867   :  { %1602 = vsyncadd [#allocation4], 4294967168 }
 0x868   :  { %916 = vsyncpa [#allocation3], 1 }
 0x869   :  { %917 = vsyncpa [#allocation6], 1 }
 0x86a   :  { %918 = vsyncpa [#allocation9], 1 }
 0x86b   :  { %919 = vsyncpa [#allocation12], 1 }
 0x86c   :  { %920 = vsyncpa [#allocation4], 1 }

</bundles_post_ra>
